<compile_context>
chip_gen: v6e
topology: v6e:2x2x1
jax: 0.10.0
libtpu: 0.0.40
codegen_flags: <defaults>
</compile_context>

<pallas_src>
import functools

import jax
import jax.numpy as jnp
from jax.experimental import pallas as pl
from jax.experimental.pallas import tpu as pltpu

EPSILON = 1e-4
LANE = 128
MIN_STEPS = 8  # keep enough grid steps that in/out DMAs overlap across
               # iterations and v7x's two TensorCores both stream from HBM.


def _round_up(x, m):
    return ((x + m - 1) // m) * m


def _device_config():
    """Per-generation tile-byte budget / VMEM limit (conservative default)."""
    kind = ""
    try:
        kind = jax.devices()[0].device_kind.lower()
    except Exception:
        pass
    vmem_cap = None
    try:
        vmem_cap = getattr(pltpu.get_tpu_info(), "vmem_capacity_bytes", None)
    except Exception:
        pass
    if vmem_cap is None:
        big = any(t in kind for t in ("v2", "v3", "v4", "v5", "v6"))
        vmem_cap = (128 if big else 64) * 1024 * 1024
    if vmem_cap >= 100 * 1024 * 1024:
        # v5e / v6e class parts: 128 MiB VMEM -> bigger tiles are free.
        tile_bytes = 4 * 1024 * 1024       # ~4 MiB per input tile
        vmem_limit = 96 * 1024 * 1024
    else:
        # v7x class (64 MiB physical VMEM) and unknown parts: stay conservative.
        tile_bytes = 2 * 1024 * 1024       # double-buffered slab ~= 24 MiB
        vmem_limit = 40 * 1024 * 1024
    # bf16 VALU exists on v6e and newer; keep f32 math on v5e and older.
    native_bf16 = not any(t in kind for t in ("v2", "v3", "v4", "v5"))
    return tile_bytes, vmem_limit, native_bf16


def _fast_tiling(n, r, itemsize, tile_bytes, sublane):
    """Pick (nb, tr): batch rows per step and r-rows per step."""
    row_bytes = r * LANE * itemsize
    # Merge batch rows so small feature maps amortize per-step overhead ...
    if row_bytes <= tile_bytes:
        nb = max(1, min(n, tile_bytes // row_bytes))
    else:
        nb = 1
    # ... but never collapse the grid below ~MIN_STEPS batch steps.
    nb = min(nb, max(1, pl.cdiv(n, MIN_STEPS)))
    grid_b = pl.cdiv(n, nb)
    # Split the row axis: honor the per-tile byte budget and keep >= MIN_STEPS
    # total grid steps so prefetch of block i+1 overlaps writeback of block i.
    nt = pl.cdiv(nb * row_bytes, tile_bytes)
    nt = max(nt, pl.cdiv(MIN_STEPS, grid_b))
    nt = min(nt, max(1, r // sublane))          # >= one packed sublane group
    if nt <= 1:
        tr = r
    else:
        tr = min(r, _round_up(pl.cdiv(r, nt), sublane))   # balanced tiles
    return nb, tr


def _concat_bifpn_kernel(w_ref, x0_ref, x1_ref, x2_ref, o_ref, *, native_mul):
    # w_ref: (3,) f32 in SMEM (scalar-prefetched).
    # x*_ref: (NB, TR, 128); o_ref: (NB, 3, TR, 128).
    w0 = w_ref[0]
    w1 = w_ref[1]
    w2 = w_ref[2]
    inv = 1.0 / (w0 + w1 + w2 + EPSILON)
    if native_mul:
        # bf16 inputs on v6e/v7x: cast the scalar once, multiply in bf16.
        s0 = (w0 * inv).astype(o_ref.dtype)
        s1 = (w1 * inv).astype(o_ref.dtype)
        s2 = (w2 * inv).astype(o_ref.dtype)
        o_ref[:, 0, :, :] = s0 * x0_ref[...]
        o_ref[:, 1, :, :] = s1 * x1_ref[...]
        o_ref[:, 2, :, :] = s2 * x2_ref[...]
    else:
        o_ref[:, 0, :, :] = ((w0 * inv) * x0_ref[...]).astype(o_ref.dtype)
        o_ref[:, 1, :, :] = ((w1 * inv) * x1_ref[...]).astype(o_ref.dtype)
        o_ref[:, 2, :, :] = ((w2 * inv) * x2_ref[...]).astype(o_ref.dtype)


def _concat_bifpn_kernel_rows(w_ref, x0_ref, x1_ref, x2_ref, o_ref, *,
                              native_mul):
    # Ragged fallback when C*H*W is not a multiple of 128.
    # x*_ref: (NB, 1, F); o_ref: (NB, 3, F).
    w0 = w_ref[0]
    w1 = w_ref[1]
    w2 = w_ref[2]
    inv = 1.0 / (w0 + w1 + w2 + EPSILON)
    if native_mul:
        s0 = (w0 * inv).astype(o_ref.dtype)
        s1 = (w1 * inv).astype(o_ref.dtype)
        s2 = (w2 * inv).astype(o_ref.dtype)
        o_ref[:, 0, :] = s0 * x0_ref[:, 0, :]
        o_ref[:, 1, :] = s1 * x1_ref[:, 0, :]
        o_ref[:, 2, :] = s2 * x2_ref[:, 0, :]
    else:
        o_ref[:, 0, :] = ((w0 * inv) * x0_ref[:, 0, :]).astype(o_ref.dtype)
        o_ref[:, 1, :] = ((w1 * inv) * x1_ref[:, 0, :]).astype(o_ref.dtype)
        o_ref[:, 2, :] = ((w2 * inv) * x2_ref[:, 0, :]).astype(o_ref.dtype)


def concat_bifpn(w, x0, x1, x2):
    """Weighted channel-concat of three NCHW tensors (BiFPN fusion).

    w:        (3,) learnable weights (un-normalized)
    x0,x1,x2: (N, C, H, W), identical shapes & dtype
    returns:  (N, 3*C, H, W)
    """
    assert x0.shape == x1.shape == x2.shape
    assert x0.dtype == x1.dtype == x2.dtype
    n, c, h, w_sp = x0.shape
    f = c * h * w_sp
    itemsize = jnp.dtype(x0.dtype).itemsize
    w32 = w.astype(jnp.float32)

    tile_bytes, vmem_limit, native_bf16 = _device_config()
    native_mul = native_bf16 and x0.dtype == jnp.bfloat16
    # Sublane packing multiple per dtype (f32: 8, bf16: 16, 8-bit: 32).
    sublane = {4: 8, 2: 16, 1: 32}.get(itemsize, 8)

    cost = pl.CostEstimate(
        flops=3 * n * f,
        transcendentals=0,
        bytes_accessed=6 * n * f * itemsize,
    )

    if f % LANE == 0:
        # Lane/sublane-dense fast path.
        r = f // LANE
        nb, tr = _fast_tiling(n, r, itemsize, tile_bytes, sublane)
        grid = (pl.cdiv(n, nb), pl.cdiv(r, tr))

        x0v = x0.reshape(n, r, LANE)
        x1v = x1.reshape(n, r, LANE)
        x2v = x2.reshape(n, r, LANE)

        x_spec = pl.BlockSpec((nb, tr, LANE), lambda b, t, w_ref: (b, t, 0))
        o_spec = pl.BlockSpec((nb, 3, tr, LANE),
                              lambda b, t, w_ref: (b, 0, t, 0))
        grid_spec = pltpu.PrefetchScalarGridSpec(
            num_scalar_prefetch=1,
            grid=grid,
            in_specs=[x_spec, x_spec, x_spec],
            out_specs=o_spec,
        )
        out = pl.pallas_call(
            functools.partial(_concat_bifpn_kernel, native_mul=native_mul),
            out_shape=jax.ShapeDtypeStruct((n, 3, r, LANE), x0.dtype),
            grid_spec=grid_spec,
            compiler_params=pltpu.CompilerParams(
                dimension_semantics=("parallel", "parallel"),
                vmem_limit_bytes=vmem_limit,
            ),
            cost_estimate=cost,
        )(w32, x0v, x1v, x2v)
    else:
        # Ragged path: batch several flattened rows per step so tiny feature
        # maps are not dominated by per-step overhead / tiny DMAs.
        nb = max(1, min(n, tile_bytes // max(1, f * itemsize)))
        nb = min(nb, max(1, pl.cdiv(n, MIN_STEPS)))

        x0v = x0.reshape(n, 1, f)
        x1v = x1.reshape(n, 1, f)
        x2v = x2.reshape(n, 1, f)

        x_spec = pl.BlockSpec((nb, 1, f), lambda b, w_ref: (b, 0, 0))
        o_spec = pl.BlockSpec((nb, 3, f), lambda b, w_ref: (b, 0, 0))
        grid_spec = pltpu.PrefetchScalarGridSpec(
            num_scalar_prefetch=1,
            grid=(pl.cdiv(n, nb),),
            in_specs=[x_spec, x_spec, x_spec],
            out_specs=o_spec,
        )
        out = pl.pallas_call(
            functools.partial(_concat_bifpn_kernel_rows, native_mul=native_mul),
            out_shape=jax.ShapeDtypeStruct((n, 3, f), x0.dtype),
            grid_spec=grid_spec,
            compiler_params=pltpu.CompilerParams(
                dimension_semantics=("parallel",),
                vmem_limit_bytes=vmem_limit,
            ),
            cost_estimate=cost,
        )(w32, x0v, x1v, x2v)

    return out.reshape(n, 3 * c, h, w_sp)


def concat_bifpn_ref(w, x0, x1, x2):
    wn = w.astype(jnp.float32) / (jnp.sum(w.astype(jnp.float32)) + EPSILON)
    return jnp.concatenate(
        [(wn[0] * x0).astype(x0.dtype),
         (wn[1] * x1).astype(x1.dtype),
         (wn[2] * x2).astype(x2.dtype)],
        axis=1,
    )


if __name__ == "__main__":
    key = jax.random.PRNGKey(0)
    k0, k1, k2 = jax.random.split(key, 3)

    # nn.Parameter(torch.ones(3)) — deterministic init matching the module.
    w = jnp.ones((3,), dtype=jnp.float32)

    # Primary small-shape test.
    N, C, H, W = 2, 4, 16, 16
    x0 = jax.random.normal(k0, (N, C, H, W), dtype=jnp.float32)
    x1 = jax.random.normal(k1, (N, C, H, W), dtype=jnp.float32)
    x2 = jax.random.normal(k2, (N, C, H, W), dtype=jnp.float32)
    out = jax.block_until_ready(concat_bifpn(w, x0, x1, x2))
    ref = concat_bifpn_ref(w, x0, x1, x2)
    assert out.shape == (N, 3 * C, H, W)
    assert jnp.allclose(out, ref, atol=1e-6, rtol=1e-6)

    # Non-divisible N / r: exercises partial boundary blocks on both grid axes.
    y0 = jax.random.normal(k0, (9, 10, 16, 16), dtype=jnp.float32)
    y1 = jax.random.normal(k1, (9, 10, 16, 16), dtype=jnp.float32)
    y2 = jax.random.normal(k2, (9, 10, 16, 16), dtype=jnp.float32)
    out_p = jax.block_until_ready(concat_bifpn(w, y0, y1, y2))
    assert jnp.allclose(out_p, concat_bifpn_ref(w, y0, y1, y2),
                        atol=1e-6, rtol=1e-6)

    # Ragged fallback path (C*H*W not a multiple of 128).
    z0 = jax.random.normal(k0, (2, 3, 5, 7), dtype=jnp.float32)
    z1 = jax.random.normal(k1, (2, 3, 5, 7), dtype=jnp.float32)
    z2 = jax.random.normal(k2, (2, 3, 5, 7), dtype=jnp.float32)
    out_r = jax.block_until_ready(concat_bifpn(w, z0, z1, z2))
    assert jnp.allclose(out_r, concat_bifpn_ref(w, z0, z1, z2),
                        atol=1e-6, rtol=1e-6)

    # bf16 path (native-dtype multiply on v6e/v7x, f32 math on older parts).
    b0 = jax.random.normal(k0, (N, C, H, W)).astype(jnp.bfloat16)
    b1 = jax.random.normal(k1, (N, C, H, W)).astype(jnp.bfloat16)
    b2 = jax.random.normal(k2, (N, C, H, W)).astype(jnp.bfloat16)
    out_b = jax.block_until_ready(concat_bifpn(w, b0, b1, b2))
    ref_b = concat_bifpn_ref(w, b0, b1, b2)
    assert jnp.allclose(out_b.astype(jnp.float32), ref_b.astype(jnp.float32),
                        atol=2e-2, rtol=2e-2)

    print("KERNEL_OK")
</pallas_src>

<mosaic_0001>
module attributes {stable_mosaic.version = 11 : i64} {
  func.func @_concat_bifpn_kernel(%arg0: i32, %arg1: i32, %arg2: memref<3xf32, #tpu.memory_space<smem>>, %arg3: memref<1x8x128xf32, #tpu.memory_space<vmem>>, %arg4: memref<1x8x128xf32, #tpu.memory_space<vmem>>, %arg5: memref<1x8x128xf32, #tpu.memory_space<vmem>>, %arg6: memref<1x3x8x128xf32, #tpu.memory_space<vmem>>) attributes {dimension_semantics = [#tpu.dimension_semantics<parallel>, #tpu.dimension_semantics<parallel>], iteration_bounds = array<i64: 2, 1>, scalar_prefetch = 1 : i64, scratch_operands = 0 : i64, tpu.core_type = #tpu.core_type<tc>, window_params = [{transform_indices = @transform_0, window_bounds = array<i64: 1, 8, 128>}, {transform_indices = @transform_1, window_bounds = array<i64: 1, 8, 128>}, {transform_indices = @transform_2, window_bounds = array<i64: 1, 8, 128>}, {transform_indices = @transform_3, window_bounds = array<i64: 1, 3, 8, 128>}]} {
    %c0 = arith.constant 0 : index
    %0 = memref.load %arg2[%c0] : memref<3xf32, #tpu.memory_space<smem>>
    %c1 = arith.constant 1 : index
    %1 = memref.load %arg2[%c1] : memref<3xf32, #tpu.memory_space<smem>>
    %c2 = arith.constant 2 : index
    %2 = memref.load %arg2[%c2] : memref<3xf32, #tpu.memory_space<smem>>
    %3 = arith.addf %0, %1 : f32
    %4 = arith.addf %3, %2 : f32
    %cst = arith.constant 9.99999974E-5 : f32
    %5 = arith.addf %4, %cst : f32
    %cst_0 = arith.constant 1.000000e+00 : f32
    %6 = arith.divf %cst_0, %5 : f32
    %7 = arith.mulf %0, %6 : f32
    %c0_1 = arith.constant 0 : index
    %c0_2 = arith.constant 0 : index
    %c0_3 = arith.constant 0 : index
    %8 = vector.load %arg3[%c0_1, %c0_2, %c0_3] : memref<1x8x128xf32, #tpu.memory_space<vmem>>, vector<1x8x128xf32>
    %9 = vector.broadcast %7 : f32 to vector<1x8x128xf32>
    %10 = arith.mulf %9, %8 : vector<1x8x128xf32>
    %c0_4 = arith.constant 0 : index
    %c0_5 = arith.constant 0 : index
    %c0_6 = arith.constant 0 : index
    %c0_7 = arith.constant 0 : index
    %11 = vector.load %arg6[%c0_4, %c0_5, %c0_6, %c0_7] : memref<1x3x8x128xf32, #tpu.memory_space<vmem>>, vector<1x1x8x128xf32>
    %12 = vector.shape_cast %11 : vector<1x1x8x128xf32> to vector<1x8x128xf32>
    %13 = vector.shape_cast %10 : vector<1x8x128xf32> to vector<1x1x8x128xf32>
    tpu.vector_store %arg6[%c0_4, %c0_5, %c0_6, %c0_7], %13 {strides = array<i32>} : memref<1x3x8x128xf32, #tpu.memory_space<vmem>>, vector<1x1x8x128xf32>,
    %14 = arith.mulf %1, %6 : f32
    %c0_8 = arith.constant 0 : index
    %c0_9 = arith.constant 0 : index
    %c0_10 = arith.constant 0 : index
    %15 = vector.load %arg4[%c0_8, %c0_9, %c0_10] : memref<1x8x128xf32, #tpu.memory_space<vmem>>, vector<1x8x128xf32>
    %16 = vector.broadcast %14 : f32 to vector<1x8x128xf32>
    %17 = arith.mulf %16, %15 : vector<1x8x128xf32>
    %c0_11 = arith.constant 0 : index
    %c1_12 = arith.constant 1 : index
    %c0_13 = arith.constant 0 : index
    %c0_14 = arith.constant 0 : index
    %18 = vector.load %arg6[%c0_11, %c1_12, %c0_13, %c0_14] : memref<1x3x8x128xf32, #tpu.memory_space<vmem>>, vector<1x1x8x128xf32>
    %19 = vector.shape_cast %18 : vector<1x1x8x128xf32> to vector<1x8x128xf32>
    %20 = vector.shape_cast %17 : vector<1x8x128xf32> to vector<1x1x8x128xf32>
    tpu.vector_store %arg6[%c0_11, %c1_12, %c0_13, %c0_14], %20 {strides = array<i32>} : memref<1x3x8x128xf32, #tpu.memory_space<vmem>>, vector<1x1x8x128xf32>,
    %21 = arith.mulf %2, %6 : f32
    %c0_15 = arith.constant 0 : index
    %c0_16 = arith.constant 0 : index
    %c0_17 = arith.constant 0 : index
    %22 = vector.load %arg5[%c0_15, %c0_16, %c0_17] : memref<1x8x128xf32, #tpu.memory_space<vmem>>, vector<1x8x128xf32>
    %23 = vector.broadcast %21 : f32 to vector<1x8x128xf32>
    %24 = arith.mulf %23, %22 : vector<1x8x128xf32>
    %c0_18 = arith.constant 0 : index
    %c2_19 = arith.constant 2 : index
    %c0_20 = arith.constant 0 : index
    %c0_21 = arith.constant 0 : index
    %25 = vector.load %arg6[%c0_18, %c2_19, %c0_20, %c0_21] : memref<1x3x8x128xf32, #tpu.memory_space<vmem>>, vector<1x1x8x128xf32>
    %26 = vector.shape_cast %25 : vector<1x1x8x128xf32> to vector<1x8x128xf32>
    %27 = vector.shape_cast %24 : vector<1x8x128xf32> to vector<1x1x8x128xf32>
    tpu.vector_store %arg6[%c0_18, %c2_19, %c0_20, %c0_21], %27 {strides = array<i32>} : memref<1x3x8x128xf32, #tpu.memory_space<vmem>>, vector<1x1x8x128xf32>,
    return
  }
  func.func @transform_0(%arg0: i32, %arg1: i32, %arg2: memref<3xf32, #tpu.memory_space<smem>>) -> (i32, i32, i32) {
    %c0_i32 = arith.constant 0 : i32
    %c0_i32_0 = arith.constant 0 : i32
    return %arg0, %arg1, %c0_i32 : i32, i32, i32
  }
  func.func @transform_1(%arg0: i32, %arg1: i32, %arg2: memref<3xf32, #tpu.memory_space<smem>>) -> (i32, i32, i32) {
    %c0_i32 = arith.constant 0 : i32
    %c0_i32_0 = arith.constant 0 : i32
    return %arg0, %arg1, %c0_i32 : i32, i32, i32
  }
  func.func @transform_2(%arg0: i32, %arg1: i32, %arg2: memref<3xf32, #tpu.memory_space<smem>>) -> (i32, i32, i32) {
    %c0_i32 = arith.constant 0 : i32
    %c0_i32_0 = arith.constant 0 : i32
    return %arg0, %arg1, %c0_i32 : i32, i32, i32
  }
  func.func @transform_3(%arg0: i32, %arg1: i32, %arg2: memref<3xf32, #tpu.memory_space<smem>>) -> (i32, i32, i32, i32) {
    %c0_i32 = arith.constant 0 : i32
    %c0_i32_0 = arith.constant 0 : i32
    %c0_i32_1 = arith.constant 0 : i32
    return %arg0, %c0_i32, %arg1, %c0_i32_0 : i32, i32, i32, i32
  }
}

</mosaic_0001>

<bundles_post_ra>
// kernel: tpu_custom_call.1
= control target key start
LH: loop header
LB: loop body
LE: loop exit
PB: predicated region body
PF: predicated region fallthrough
CT: control target
= control target key end

     0   :  { %s737_s15 = smov [#allocation3]   ;;  %s984_s0 = inlined_call_operand.hbm [shape: f32[3], index: 0, kind: input, shape index: {}]   ;;  %s985_s1 = inlined_call_operand.hbm [shape: f32[2,8,128], index: 1, kind: input, shape index: {}]   ;;  %s986_s2 = inlined_call_operand.hbm [shape: f32[2,8,128], index: 2, kind: input, shape index: {}]   ;;  %s987_s3 = inlined_call_operand.hbm [shape: f32[2,8,128], index: 3, kind: input, shape index: {}]   ;;  %s988_s4 = inlined_call_operand.hbm [shape: f32[2,3,8,128], index: 4, kind: output, shape index: {}]  }
   0x1   :  { %992 = sst [smem:[#allocation17_spill]] %s986_s2 }
   0x2   :  { %10 = dma.hbm_to_smem %s984_s0, 16, %s737_s15, [#allocation2] }
   0x3   :  { %699 = dma.done.wait [#allocation2], 16 }
   0x4   :  { %700 = vsyncadd [#allocation2], 4294967280 }
   0x5   :  { %12 = sfence }
   0x6   :  { %13 = vsyncpa [#allocation5], 0 }
   0x7   :  { %15 = vsyncpa [#allocation5 + $0x1], 0 }
   0x8   :  { %16 = vsyncpa [#allocation8], 0 }
   0x9   :  { %18 = vsyncpa [#allocation8 + $0x1], 0 }
   0xa   :  { %19 = vsyncpa [#allocation6], 0 }
   0xb   :  { %21 = vsyncpa [#allocation6 + $0x1], 0  ;;  %s772_s18 = smov 0   ;;  %s774_s19 = smov 0  }
   0xc   :  { %s776_s20 = smov 0   ;;  %s778_s21 = smov 0  }
   0xd   :  { %s780_s22 = smov 0   ;;  %s782_s0 = smov 0  }
   0xe LB: > { %993 = sst [smem:[#allocation15_spill]] %s731_s22  ;;  %s803_s23 = sadd.s32 4294967295, %s735_s0   ;;  %s735_s0 = sphi %s782_s0, %s27_s0   ;;  %s731_s22 = sphi %s780_s22, %s1005_s22   ;;  %s727_s21 = sphi %s778_s21, %s1004_s21   ;;  %s723_s20 = sphi %s776_s20, %s1008_s20   ;;  %s719_s19 = sphi %s774_s19, %s1007_s19   ;;  %s715_s18 = sphi %s772_s18, %s1006_s18  }
   0xf   : > { %s456_s24 = sadd.s32 4294967294, %s735_s0   ;;  %s39_s25 = sadd.s32 1, %s731_s22 }
  0x10   : > { %s48_s26 = sadd.s32 1, %s723_s20  ;;  %p41_p0 = scmp.ge.s32.totalorder %s39_s25, 2 }
  0x11   : > { %p55_p1 = scmp.ne.s32.totalorder %s723_s20, %s719_s19  ;;  %p56_p2 = scmp.eq.s32.totalorder %s735_s0, 0 }
  0x12   : > { %p61_p3 = scmp.ne.s32.totalorder %s719_s19, %s715_s18  ;;  %s1010_s25 = smov (%p41_p0, %s39_s25), 0 }
  0x13   : > { %994 = sst [smem:[#allocation16_spill]] %s1010_s25  ;;  %p815_p4 = por %p56_p2, %p55_p1 }
  0x14   : > { %p62_p5 = scmp.eq.s32.totalorder %s803_s23, 0  ;;  %s43_s28 = ssub.s32 %s731_s22, %s1010_s25 }
  0x15   : > { %p143_p6 = scmp.eq.s32.totalorder %s803_s23, 1  ;;  %p46_p7 = scmp.eq.s32.totalorder %s43_s28, 0 }
  0x16   : > { %p823_p8 = por %p62_p5, %p61_p3  ;;  %p149_p10 = scmp.eq.s32.totalorder %s456_s24, 1 }
  0x17   : > { %p827_p9 = por %p143_p6, %p55_p1  ;;  %p502_p13 = scmp.lt.s32.totalorder %s735_s0, 2 }
  0x18   : > { %s832_s5 = scalar_select %p46_p7, %s723_s20, %s48_s26  }
  0x19   : > { %p834_p11 = por %p149_p10, %p61_p3  ;;  %s989_s7 = sand.u32 1, %s723_s20  }
  0x1a   : > { %s843_s8 = sshll.u32 %s989_s7, 3  ;;  %s846_s9 = sshll.u32 %s731_s22, 7 }
  0x1b   : > { %p850_p0 = pnand %p502_p13, %p815_p4  ;;  %s188_s11 = sand.u32 1, %s735_s0  }
  0x1c   : > { %s1000_s2 = sld [smem:[#allocation17_spill]]  ;;  %s192_s15 = scalar_lea.vmem [#allocation7], %s843_s8 }
  0x1d   : > { %s200_s16 = sshll.u32 %s192_s15, 4  ;;  %p465_p1 = scmp.ge.s32.totalorder %s735_s0, 1  ;;  %s201_s16 = int_to_ptr.vmem [resolvable:$true] %s200_s16 }
  0x1e   : > { %p224_p2 = scmp.lt.s32.totalorder %s735_s0, 3  ;;  %s862_s17 = scalar_lea.sflag [#allocation8], %s188_s11 }
  0x1f   : > { %p567_p3 = pneg %p850_p0  ;;  %s578_s24 = scalar_lea.vmem %s201_s16, 128 }
  0x20   : > { %p579_p4 = scmp.ne.s32.totalorder %s201_s16, %s578_s24  ;;  %s738_s26 = smov [#allocation7]  }
  0x21   : > { %s583_s27 = sshll.u32 %s738_s26, 4  ;;  %s584_s27 = int_to_ptr.vmem [resolvable:$false] %s583_s27 }
  0x22   : > { %s198_s14 = scalar_lea.hbm %s1000_s2, %s846_s9  ;;  %p581_p5 = pnand %p579_p4, %p567_p3 }
  0x23   : > { %s585_s28 = scalar_lea.vmem %s584_s27, 256  ;;  %p586_p7 = scmp.lt.s32.totalorder %s201_s16, %s584_s27 }
  0x24   : > { %p582_p6 = pneg %p581_p5  ;;  %p587_p10 = scmp.lt.s32.totalorder %s585_s28, %s578_s24 }
  0x26   : > { %p588_p13 = por %p587_p10, %p586_p7 }
  0x28   : > { %p589_p12 = pnand %p588_p13, %p582_p6 }
  0x2a   : > { %592 = shalt.err (!%p589_p12)
}
  0x2b   : > { %494 = dma.hbm_to_vmem [thread:$0]  (!%p850_p0), %s198_s14, 128, %s201_s16, %s862_s17  }
  0x2c   : > { %p876_p4 = pnand %p465_p1, %p224_p2  ;;  %s179_s15 = scalar_lea.hbm %s985_s1, %s846_s9 }
  0x2d   : > { %s173_s24 = scalar_lea.vmem [#allocation4], %s843_s8  ;;  %s217_s7 = scalar_lea.hbm %s987_s3, %s846_s9 }
  0x2e   : > { %s181_s26 = sshll.u32 %s173_s24, 4  ;;  %s1002_s2 = sand.u32 1, %s723_s20   ;;  %s182_s26 = int_to_ptr.vmem [resolvable:$true] %s181_s26 }
  0x2f   : > { %s170_s25 = scalar_lea.sflag [#allocation5], %s1002_s2  ;;  %s606_s14 = scalar_lea.vmem %s182_s26, 128 }
  0x30   : > { %p607_p12 = scmp.ne.s32.totalorder %s182_s26, %s606_s14  ;;  %s739_s16 = smov [#allocation4]  }
  0x31   : > { %s611_s22 = sshll.u32 %s739_s16, 4  ;;  %s612_s22 = int_to_ptr.vmem [resolvable:$false] %s611_s22 }
  0x32   : > { %p609_p1 = pnand %p607_p12, %p567_p3  ;;  %s613_s12 = scalar_lea.vmem %s612_s22, 256 }
  0x33   : > { %p614_p5 = scmp.lt.s32.totalorder %s182_s26, %s612_s22  ;;  %p615_p6 = scmp.lt.s32.totalorder %s613_s12, %s606_s14 }
  0x34   : > { %p610_p2 = pneg %p609_p1 }
  0x35   : > { %p616_p7 = por %p615_p6, %p614_p5 }
  0x37   : > { %p617_p10 = pnand %p616_p7, %p610_p2 }
  0x39   : > { %620 = shalt.err (!%p617_p10)
}
  0x3a   : > { %491 = dma.hbm_to_vmem [thread:$0]  (!%p850_p0), %s179_s15, 128, %s182_s26, %s170_s25  }
  0x3b   : > { %s211_s2 = scalar_lea.vmem [#allocation9], %s843_s8  ;;  %s740_s27 = smov [#allocation9]  }
  0x3c   : > { %s219_s13 = sshll.u32 %s211_s2, 4  ;;  %s639_s22 = sshll.u32 %s740_s27, 4  ;;  %s220_s13 = int_to_ptr.vmem [resolvable:$true] %s219_s13  ;;  %s640_s22 = int_to_ptr.vmem [resolvable:$false] %s639_s22 }
  0x3d   : > { %s634_s24 = scalar_lea.vmem %s220_s13, 128  ;;  %s641_s28 = scalar_lea.vmem %s640_s22, 256 }
  0x3e   : > { %p635_p13 = scmp.ne.s32.totalorder %s220_s13, %s634_s24  ;;  %p642_p2 = scmp.lt.s32.totalorder %s220_s13, %s640_s22 }
  0x3f   : > { %p643_p5 = scmp.lt.s32.totalorder %s641_s28, %s634_s24 }
  0x40   : > { %p637_p12 = pnand %p635_p13, %p567_p3 }
  0x41   : > { %p644_p6 = por %p643_p5, %p642_p2 }
  0x42   : > { %p638_p1 = pneg %p637_p12 }
  0x44   : > { %p645_p7 = pnand %p644_p6, %p638_p1 }
  0x46   : > { %648 = shalt.err (!%p645_p7)
}
  0x47   : > { %497 = dma.hbm_to_vmem [thread:$0]  (!%p850_p0), %s217_s7, 128, %s220_s13, %s862_s17  }
  0x48   : > { %228 = sbr.rel (%p876_p4) target bundleno = 181 (0xb5), region = 32  ;;  %s911_s15 = sand.u32 (!%p876_p4), 1, %s719_s19  }
  0x49   : > { %s914_s26 = sshll.u32 (!%p876_p4), %s911_s15, 3  ;;  %s231_s10 = scalar_lea.sflag (!%p876_p4), [#allocation5], %s911_s15 }
  0x4a   : > { %s234_s14 = scalar_lea.vmem (!%p876_p4), [#allocation4], %s914_s26 }
  0x4d   : > { %702 = dma.done.wait (%p823_p8), %s231_s10, 128  }
  0x4e   : > { %704 = vsyncadd (%p823_p8), %s231_s10, 4294967168  ;;  %s239_s7 = sand.u32 1, %s803_s23   ;;  %s243_s17 = scalar_lea.vmem [#allocation7], %s914_s26 }
  0x4f   : > { %s240_s9 = scalar_lea.sflag [#allocation8], %s239_s7 }
  0x50   : > { %706 = dma.done.wait (%p823_p8), %s240_s9, 256  }
  0x51   : > { %708 = vsyncadd (%p823_p8), %s240_s9, 4294967040  ;;  %s285_s11 = sld [smem:[#allocation3]]  ;;  %s476_s23 = smul.u32 24, %s911_s15  ;;  %v295_v2 = vld [vmem:[%s234_s14] sm:$0xff]  ;;  %v300_v3 = vld [vmem:[%s243_s17] sm:$0xff] }
  0x52   : > { %s469_s16 = sld [smem:[#allocation3 + $0x1]]  ;;  %s479_s22 = smul.u32 384, %s727_s21 }
  0x53   : > { %s470_s12 = sld [smem:[#allocation3 + $0x2]]  ;;  %s284_s25 = scalar_lea.vmem [#allocation10], %s476_s23 }
  0x54   : > { %s326_s8 = sshll.u32 %s284_s25, 4  ;;  %s252_s7 = scalar_lea.vmem [#allocation9], %s914_s26  ;;  %s931_s8 = int_to_ptr.vmem [resolvable:$true] %s326_s8 }
  0x55   : > { %v306_v5 = vld [vmem:[%s252_s7] sm:$0xff]  ;;  %s936_s9 = scalar_lea.hbm %s988_s4, %s479_s22  ;;  %s312_s26 = scalar_lea.sflag [#allocation6], %s911_s15 }
  0x56   : > { %s649_s17 = scalar_lea.vmem %s931_s8, 384 }
  0x57   : > { %p650_p8 = scmp.ne.s32.totalorder %s931_s8, %s649_s17 }
  0x58   : > { %s288_s2 = sadd.f32 %s469_s16, %s285_s11 }
  0x59   : > { %p651_p0 = pnand %p650_p8, %p827_p9 }
  0x5a   : > { %s289_s13 = sadd.f32 %s470_s12, %s288_s2 }
  0x5b   : > { %p652_p3 = pneg %p651_p0 }
  0x5c   : > { %s290_s24 = sadd.f32 0.0001, %s289_s13 }
  0x5e   : > { %v291_v0 = vstv %s290_s24 }
  0x5f   : > { %555 = vrcp.f32 %v291_v0 }
  0x6c   : > { %v556_v1 = vpop.eup %555 }
  0x6d   : > { %477 = vpush %v556_v1 }
  0x9e   : > { %s478_s27 = spop %477 }
  0x9f   : > { %s294_s28 = smul.f32 %s478_s27, %s285_s11  ;;  %s741_s11 = smov [#allocation10]  }
  0xa0   : > { %s299_s29 = smul.f32 %s478_s27, %s469_s16  ;;  %s653_s16 = sshll.u32 %s741_s11, 4  ;;  %s654_s16 = int_to_ptr.vmem [resolvable:$false] %s653_s16 }
  0xa1   : > { %v296_v4 = vstv %s294_s28  ;;  %s305_s10 = smul.f32 %s478_s27, %s470_s12  ;;  %s655_s12 = scalar_lea.vmem %s654_s16, 768 }
  0xa2   : > { %v297_v6 = vmul.f32 %v296_v4, %v295_v2  ;;  %v301_v7 = vstv %s299_s29  ;;  %p656_p4 = scmp.lt.s32.totalorder %s931_s8, %s654_s16  ;;  %p657_p10 = scmp.lt.s32.totalorder %s655_s12, %s649_s17 }
  0xa3   : > { %v302_v8 = vmul.f32 %v301_v7, %v300_v3  ;;  %v307_v9 = vstv %s305_s10 }
  0xa4   : > { %298 = vst [vmem:[%s284_s25] sm:$0xff] %v297_v6  ;;  %v308_v10 = vmul.f32 %v307_v9, %v306_v5  ;;  %p658_p13 = por %p657_p10, %p656_p4 }
  0xa5   : > { %471 = vst [vmem:[%s284_s25 + $0x8] sm:$0xff] %v302_v8 }
  0xa6   : > { %472 = vst [vmem:[%s284_s25 + $0x10] sm:$0xff] %v308_v10  ;;  %p659_p12 = pnand %p658_p13, %p652_p3 }
  0xa8   : > { %662 = shalt.err (!%p659_p12)
}
  0xa9   : > { %s663_s2 = scalar_lea.hbm %s936_s9, 384  ;;  %s667_s23 = scalar_lea.hbm %s988_s4, 768 }
  0xaa   : > { %p664_p1 = scmp.ne.s32.totalorder %s936_s9, %s663_s2  ;;  %p668_p6 = scmp.lt.s32.totalorder %s936_s9, %s988_s4 }
  0xab   : > { %p669_p7 = scmp.lt.s32.totalorder %s667_s23, %s663_s2 }
  0xac   : > { %p665_p2 = pnand %p664_p1, %p827_p9 }
  0xad   : > { %p670_p8 = por %p669_p7, %p668_p6 }
  0xae   : > { %p666_p5 = pneg %p665_p2 }
  0xb0   : > { %p671_p0 = pnand %p670_p8, %p666_p5 }
  0xb2   : > { %674 = shalt.err (!%p671_p0)
}
  0xb3   : > { %s742_s28 = smov 128   ;;  %s743_s29 = smov 8  }
  0xb4   : > { %486 = dma.vmem_to_hbm [thread:$0]  (%p827_p9), %s931_s8, 384, %s936_s9, %s312_s26, %s742_s28, %s742_s28, %s743_s29  }
  0xb5 PF: > { %s341_s25 = sand.u32 1, %s715_s18   ;;  %p1003_p3 = scmp.ge.s32.totalorder %s735_s0, 2 }
  0xb6   : > { %s342_s10 = scalar_lea.sflag [#allocation6], %s341_s25 }
  0xb7   : > { %p499_p4 = pnand %p1003_p3, %p834_p11 }
  0xb9   : > { %p500_p10 = pneg %p499_p4 }
  0xbb   : > { %710 = dma.done.wait (%p500_p10), %s342_s10, 384  }
  0xbc   : > { %712 = vsyncadd (%p500_p10), %s342_s10, 4294966912  ;;  %s27_s0 = sadd.s32 1, %s735_s0   ;;  %s1004_s21 = sld [smem:[#allocation15_spill]] }
  0xbd   : > { %p24_p13 = scmp.ge.s32.totalorder %s27_s0, 4   ;;  %s1005_s22 = sld [smem:[#allocation16_spill]] }
  0xbe   : > { %s1006_s18 = smov %s719_s19  ;;  %s1007_s19 = smov %s723_s20 }
  0xbf   : > { %s1008_s20 = smov %s832_s5  ;;  %26 = sbr.rel (!%p24_p13) target bundleno = 14 (0xe), region = 103 }
  0xc4   :  { %347 = vsyncpa [#allocation5], 1 }
  0xc5   :  { %349 = vsyncpa [#allocation5 + $0x1], 1 }
  0xc6   :  { %350 = vsyncpa [#allocation8], 1 }
  0xc7   :  { %352 = vsyncpa [#allocation8 + $0x1], 1 }
  0xc8   :  { %353 = vsyncpa [#allocation6], 1 }
  0xc9   :  { %355 = vsyncpa [#allocation6 + $0x1], 1 }

</bundles_post_ra>
